<compile_context>
chip_gen: v7x
topology: tpu7x:2x2x1
jax: 0.10.0
libtpu: 0.0.40
codegen_flags: <defaults>
</compile_context>

<pallas_src>
import functools

import jax
import jax.numpy as jnp
from jax.experimental import pallas as pl
from jax.experimental.pallas import tpu as pltpu


def _round_up(x, m):
    return ((x + m - 1) // m) * m


def _nystroem_rbf_kernel(x_ref, comp_t_ref, c_norm_ref, norm_t_ref, o_ref, *, neg_gamma):
    # x_ref:      (bm, Dp) tile of (padded) inputs
    # comp_t_ref: (Dp, Cp) components, pre-transposed, grid-invariant
    # c_norm_ref: (1, Cp)  precomputed ||c_j||^2, grid-invariant
    # norm_t_ref: (Cp, Cp) normalization.T, grid-invariant
    # o_ref:      (bm, Cp) output tile
    x = x_ref[...].astype(jnp.float32)

    # ||x||^2 + ||c||^2 - 2<x, c>, clamped at 0.
    dots = jnp.dot(x, comp_t_ref[...], preferred_element_type=jnp.float32)   # (bm, Cp) MXU
    x_norm = jnp.sum(x * x, axis=-1, keepdims=True)                          # (bm, 1)  VPU+XLU
    dists = jnp.maximum(x_norm + c_norm_ref[...] - 2.0 * dots, 0.0)          # (bm, Cp) VPU

    k = jnp.exp(neg_gamma * dists)                                           # (bm, Cp) EUP

    out = jnp.dot(k, norm_t_ref[...], preferred_element_type=jnp.float32)    # (bm, Cp) MXU
    o_ref[...] = out.astype(o_ref.dtype)


def torch_nystroem_forward(x, components, normalization, *, gamma=None,
                           block_m=512, vmem_budget_bytes=12 * 1024 * 1024):
    """Pallas implementation of TorchNystroem.forward with an 'rbf' Kernel."""
    N, D = x.shape
    C, Dc = components.shape
    assert D == Dc
    assert normalization.shape == (C, C)
    if gamma is None:
        gamma = 1.0 / D  # Kernel._gamma default when has_gamma=False

    # Lane-dense padded dimensions.
    Dp = _round_up(D, 128)
    Cp = _round_up(C, 128)

    # Pick an MXU-aligned row tile, clamped by N and a conservative VMEM
    # budget (double-buffered x/out tiles + resident small operands,
    # conservatively counted twice) so the same code stays inside default
    # scoped VMEM limits on v5e / v6e / v7x.
    bm = max(8, min(int(block_m), _round_up(N, 8)))
    bm = _round_up(bm, 8)

    def _footprint(b):
        return 4 * (2 * b * (Dp + Cp) + 2 * (Dp * Cp + Cp * Cp + Cp))

    while bm > 8 and _footprint(bm) > vmem_budget_bytes:
        bm = max(8, _round_up(bm // 2, 8))

    Np = _round_up(N, bm)
    grid = (Np // bm,)

    f32 = jnp.float32
    x_p = jnp.zeros((Np, Dp), f32).at[:N, :D].set(x.astype(f32))
    comp_t = jnp.zeros((Dp, Cp), f32).at[:D, :C].set(components.astype(f32).T)
    c_norm = jnp.zeros((1, Cp), f32).at[:, :C].set(
        jnp.sum(components.astype(f32) ** 2, axis=-1)[None, :])
    # Zero-padded rows of normalization.T annihilate the padded K columns.
    norm_t = jnp.zeros((Cp, Cp), f32).at[:C, :C].set(normalization.astype(f32).T)

    kernel = functools.partial(_nystroem_rbf_kernel, neg_gamma=-float(gamma))

    out_p = pl.pallas_call(
        kernel,
        out_shape=jax.ShapeDtypeStruct((Np, Cp), x.dtype),
        grid_spec=pltpu.PrefetchScalarGridSpec(
            num_scalar_prefetch=0,
            grid=grid,
            in_specs=[
                pl.BlockSpec((bm, Dp), lambda i: (i, 0)),   # x tile
                pl.BlockSpec((Dp, Cp), lambda i: (0, 0)),   # components.T (resident)
                pl.BlockSpec((1, Cp), lambda i: (0, 0)),    # ||c||^2       (resident)
                pl.BlockSpec((Cp, Cp), lambda i: (0, 0)),   # norm.T        (resident)
            ],
            out_specs=pl.BlockSpec((bm, Cp), lambda i: (i, 0)),
        ),
        compiler_params=pltpu.CompilerParams(
            dimension_semantics=("parallel",),
        ),
    )(x_p, comp_t, c_norm, norm_t)

    # Strip row/column padding.
    return out_p[:N, :C]


def _reference(x, components, normalization, gamma):
    x_norm = jnp.sum(x ** 2, axis=-1)[:, None]
    y_norm = jnp.sum(components ** 2, axis=-1)[None]
    dots = x @ components.T
    dists = jnp.maximum(x_norm + y_norm - 2 * dots, 0.0)
    k = jnp.exp(-gamma * dists)
    return k @ normalization.T


if __name__ == "__main__":
    key = jax.random.PRNGKey(0)
    k1, k2, k3 = jax.random.split(key, 3)

    N, D, C = 64, 32, 16  # batch, n_features, n_components (small demo shapes)
    x = jax.random.normal(k1, (N, D), dtype=jnp.float32)
    components = jax.random.normal(k2, (C, D), dtype=jnp.float32)
    normalization = jax.random.normal(k3, (C, C), dtype=jnp.float32) * 0.1

    gamma = 1.0 / D

    out = torch_nystroem_forward(x, components, normalization, gamma=gamma)
    out = jax.block_until_ready(out)

    ref = _reference(x, components, normalization, gamma)
    assert out.shape == (N, C)
    assert jnp.allclose(out, ref, atol=1e-4, rtol=1e-4), (
        f"max abs err {jnp.max(jnp.abs(out - ref))}"
    )

    print("KERNEL_OK")
</pallas_src>

<mosaic_0001>
module attributes {stable_mosaic.version = 11 : i64} {
  func.func @_nystroem_rbf_kernel(%arg0: i32, %arg1: memref<64x128xf32, #tpu.memory_space<vmem>>, %arg2: memref<128x128xf32, #tpu.memory_space<vmem>>, %arg3: memref<1x128xf32, #tpu.memory_space<vmem>>, %arg4: memref<128x128xf32, #tpu.memory_space<vmem>>, %arg5: memref<64x128xf32, #tpu.memory_space<vmem>>) attributes {dimension_semantics = [#tpu.dimension_semantics<parallel>], iteration_bounds = array<i64: 1>, scalar_prefetch = 0 : i64, scratch_operands = 0 : i64, tpu.core_type = #tpu.core_type<tc>, window_params = [{transform_indices = @transform_0, window_bounds = array<i64: 64, 128>}, {pipeline_mode = #tpu.pipeline_mode<synchronous>, transform_indices = @transform_1, window_bounds = array<i64: 128, 128>}, {pipeline_mode = #tpu.pipeline_mode<synchronous>, transform_indices = @transform_2, window_bounds = array<i64: 1, 128>}, {pipeline_mode = #tpu.pipeline_mode<synchronous>, transform_indices = @transform_3, window_bounds = array<i64: 128, 128>}, {transform_indices = @transform_4, window_bounds = array<i64: 64, 128>}]} {
    %c0 = arith.constant 0 : index
    %c0_0 = arith.constant 0 : index
    %0 = vector.load %arg1[%c0, %c0_0] : memref<64x128xf32, #tpu.memory_space<vmem>>, vector<64x128xf32>
    %c0_1 = arith.constant 0 : index
    %c0_2 = arith.constant 0 : index
    %1 = vector.load %arg2[%c0_1, %c0_2] : memref<128x128xf32, #tpu.memory_space<vmem>>, vector<128x128xf32>
    %cst = arith.constant dense<0.000000e+00> : vector<64x128xf32>
    %2 = tpu.matmul %0, %1, %cst {dimension_numbers = #tpu.dot_dimension_numbers<[1], [0], [0], [1], [0, 0, 1, 1], [], []>} : vector<64x128xf32>, vector<128x128xf32>, vector<64x128xf32> -> vector<64x128xf32>
    %3 = arith.mulf %0, %0 : vector<64x128xf32>
    %cst_3 = arith.constant dense<0.000000e+00> : vector<64xf32>
    %4 = vector.multi_reduction <add>, %3, %cst_3 [1] : vector<64x128xf32> to vector<64xf32>
    %5 = vector.shape_cast %4 : vector<64xf32> to vector<64x1xf32>
    %c0_4 = arith.constant 0 : index
    %c0_5 = arith.constant 0 : index
    %6 = vector.load %arg3[%c0_4, %c0_5] : memref<1x128xf32, #tpu.memory_space<vmem>>, vector<1x128xf32>
    %7 = vector.broadcast %5 : vector<64x1xf32> to vector<64x128xf32>
    %8 = vector.broadcast %6 : vector<1x128xf32> to vector<64x128xf32>
    %9 = arith.addf %7, %8 : vector<64x128xf32>
    %cst_6 = arith.constant 2.000000e+00 : f32
    %10 = vector.broadcast %cst_6 : f32 to vector<64x128xf32>
    %11 = arith.mulf %10, %2 : vector<64x128xf32>
    %12 = arith.subf %9, %11 : vector<64x128xf32>
    %cst_7 = arith.constant 0.000000e+00 : f32
    %13 = vector.broadcast %cst_7 : f32 to vector<64x128xf32>
    %14 = arith.maximumf %12, %13 : vector<64x128xf32>
    %cst_8 = arith.constant -3.125000e-02 : f32
    %15 = vector.broadcast %cst_8 : f32 to vector<64x128xf32>
    %16 = arith.mulf %15, %14 : vector<64x128xf32>
    %17 = math.exp %16 : vector<64x128xf32>
    %c0_9 = arith.constant 0 : index
    %c0_10 = arith.constant 0 : index
    %18 = vector.load %arg4[%c0_9, %c0_10] : memref<128x128xf32, #tpu.memory_space<vmem>>, vector<128x128xf32>
    %cst_11 = arith.constant dense<0.000000e+00> : vector<64x128xf32>
    %19 = tpu.matmul %17, %18, %cst_11 {dimension_numbers = #tpu.dot_dimension_numbers<[1], [0], [0], [1], [0, 0, 1, 1], [], []>} : vector<64x128xf32>, vector<128x128xf32>, vector<64x128xf32> -> vector<64x128xf32>
    %c0_12 = arith.constant 0 : index
    %c0_13 = arith.constant 0 : index
    %20 = vector.load %arg5[%c0_12, %c0_13] : memref<64x128xf32, #tpu.memory_space<vmem>>, vector<64x128xf32>
    tpu.vector_store %arg5[%c0_12, %c0_13], %19 {strides = array<i32>} : memref<64x128xf32, #tpu.memory_space<vmem>>, vector<64x128xf32>,
    return
  }
  func.func @transform_0(%arg0: i32) -> (i32, i32) {
    %c0_i32 = arith.constant 0 : i32
    %c0_i32_0 = arith.constant 0 : i32
    return %arg0, %c0_i32 : i32, i32
  }
  func.func @transform_1(%arg0: i32) -> (i32, i32) {
    %c0_i32 = arith.constant 0 : i32
    %c0_i32_0 = arith.constant 0 : i32
    %c0_i32_1 = arith.constant 0 : i32
    return %c0_i32, %c0_i32_0 : i32, i32
  }
  func.func @transform_2(%arg0: i32) -> (i32, i32) {
    %c0_i32 = arith.constant 0 : i32
    %c0_i32_0 = arith.constant 0 : i32
    %c0_i32_1 = arith.constant 0 : i32
    return %c0_i32, %c0_i32_0 : i32, i32
  }
  func.func @transform_3(%arg0: i32) -> (i32, i32) {
    %c0_i32 = arith.constant 0 : i32
    %c0_i32_0 = arith.constant 0 : i32
    %c0_i32_1 = arith.constant 0 : i32
    return %c0_i32, %c0_i32_0 : i32, i32
  }
  func.func @transform_4(%arg0: i32) -> (i32, i32) {
    %c0_i32 = arith.constant 0 : i32
    %c0_i32_0 = arith.constant 0 : i32
    return %arg0, %c0_i32 : i32, i32
  }
}

</mosaic_0001>

<bundles_post_ra>
// kernel: tpu_custom_call.1
= control target key start
LH: loop header
LB: loop body
LE: loop exit
PB: predicated region body
PF: predicated region fallthrough
CT: control target
= control target key end

     0   :  { %9 = vsyncpa [#allocation3], 0  ;;  %s845_s0 = inlined_call_operand.hbm [shape: f32[64,128], index: 0, kind: input, shape index: {}]   ;;  %s846_s1 = inlined_call_operand.hbm [shape: f32[128,128], index: 1, kind: input, shape index: {}]   ;;  %s847_s2 = inlined_call_operand.vmem [shape: f32[1,128], index: 2, kind: input, shape index: {}]   ;;  %s848_s3 = inlined_call_operand.hbm [shape: f32[128,128], index: 3, kind: input, shape index: {}]   ;;  %s849_s4 = inlined_call_operand.hbm [shape: f32[64,128], index: 4, kind: output, shape index: {}]  }
   0x1   :  { %10 = vsyncpa [#allocation6], 0 }
   0x2   :  { %11 = vsyncpa [#allocation4], 0  ;;  %s739_s15 = smov [#allocation5]   ;;  %s740_s17 = smov [#allocation2]  }
   0x3   :  { %s29_s16 = sshll.u32 %s739_s15, 4  ;;  %s17_s18 = sshll.u32 %s740_s17, 4  ;;  %s30_s16 = int_to_ptr.vmem [resolvable:$true] %s29_s16  ;;  %s770_s18 = int_to_ptr.vmem [resolvable:$true] %s17_s18 }
   0x4   :  { %s645_s21 = scalar_lea.hbm %s846_s1, 2048 }
   0x5   :  { %p646_p0 = scmp.ne.s32.totalorder %s846_s1, %s645_s21  ;;  %p649_p1 = scmp.lt.u32.totalorder %s645_s21, %s846_s1 }
   0x7   :  { %p651_p2 = pnand %p649_p1, %p646_p0 }
   0x9   :  { %654 = shalt.err (!%p651_p2)
}
   0xa   :  { %s655_s26 = scalar_lea.vmem %s30_s16, 2048  ;;  %p660_p4 = scmp.lt.s32.totalorder %s30_s16, %s30_s16 }
   0xb   :  { %p656_p3 = scmp.ne.s32.totalorder %s30_s16, %s655_s26  ;;  %p661_p5 = scmp.lt.s32.totalorder %s655_s26, %s655_s26 }
   0xd   :  { %p662_p6 = por %p661_p5, %p660_p4 }
   0xf   :  { %p663_p7 = pnand %p662_p6, %p656_p3 }
  0x11   :  { %666 = shalt.err (!%p663_p7)
}
  0x12   :  { %s741_s27 = smov 128   ;;  %s742_s28 = smov 8  }
  0x13   :  { %35 = dma.hbm_to_vmem [thread:$0]  %s846_s1, 2048, %s30_s16, [#allocation6], %s741_s27, %s741_s27, %s742_s28  }
  0x14   :  { %s667_s7 = scalar_lea.hbm %s845_s0, 1024 }
  0x15   :  { %p668_p8 = scmp.ne.s32.totalorder %s845_s0, %s667_s7  ;;  %p671_p9 = scmp.lt.u32.totalorder %s667_s7, %s845_s0 }
  0x17   :  { %p673_p10 = pnand %p671_p9, %p668_p8 }
  0x19   :  { %676 = shalt.err (!%p673_p10)
}
  0x1a   :  { %s677_s12 = scalar_lea.vmem %s770_s18, 1024  ;;  %p682_p12 = scmp.lt.s32.totalorder %s770_s18, %s770_s18 }
  0x1b   :  { %p678_p11 = scmp.ne.s32.totalorder %s770_s18, %s677_s12  ;;  %p683_p13 = scmp.lt.s32.totalorder %s677_s12, %s677_s12 }
  0x1d   :  { %p684_p0 = por %p683_p13, %p682_p12 }
  0x1f   :  { %p685_p1 = pnand %p684_p0, %p678_p11 }
  0x21   :  { %688 = shalt.err (!%p685_p1)
}
  0x22   :  { %23 = dma.hbm_to_vmem [thread:$0]  %s845_s0, 1024, %s770_s18, [#allocation3], %s741_s27, %s741_s27, %s742_s28  }
  0x23   :  { %s743_s14 = smov [#allocation7]   ;;  %s689_s19 = scalar_lea.hbm %s848_s3, 2048 }
  0x24   :  { %s43_s15 = sshll.u32 %s743_s14, 4  ;;  %p690_p2 = scmp.ne.s32.totalorder %s848_s3, %s689_s19  ;;  %s44_s15 = int_to_ptr.vmem [resolvable:$true] %s43_s15 }
  0x25   :  { %p693_p3 = scmp.lt.u32.totalorder %s689_s19, %s848_s3 }
  0x27   :  { %p695_p4 = pnand %p693_p3, %p690_p2 }
  0x29   :  { %698 = shalt.err (!%p695_p4)
}
  0x2a   :  { %s699_s24 = scalar_lea.vmem %s44_s15, 2048  ;;  %p704_p6 = scmp.lt.s32.totalorder %s44_s15, %s44_s15 }
  0x2b   :  { %p700_p5 = scmp.ne.s32.totalorder %s44_s15, %s699_s24  ;;  %p705_p7 = scmp.lt.s32.totalorder %s699_s24, %s699_s24 }
  0x2d   :  { %p706_p8 = por %p705_p7, %p704_p6 }
  0x2f   :  { %p707_p9 = pnand %p706_p8, %p700_p5 }
  0x31   :  { %710 = shalt.err (!%p707_p9)
}
  0x32   :  { %49 = dma.hbm_to_vmem [thread:$0]  %s848_s3, 2048, %s44_s15, [#allocation6], %s741_s27, %s741_s27, %s742_s28  }
  0x33   :  { %733 = dma.done.wait [#allocation3], 1024  }
  0x34   :  { %734 = vsyncadd [#allocation3], 4294966272 }
  0x35   :  { %735 = dma.done.wait [#allocation6], 4096  }
  0x36   :  { %736 = vsyncadd [#allocation6], 4294963200  ;;  %v67_v0 = vld [vmem:[#allocation5] sm:$0xff]  ;;  %v68_v1 = vld [vmem:[#allocation5 + $0x8] sm:$0xff] }
  0x37   :  { %v69_v2 = vld [vmem:[#allocation5 + $0x10] sm:$0xff]  ;;  %v559_v3 = vpack.c.bf16 %v68_v1, %v67_v0  ;;  %v70_v4 = vld [vmem:[#allocation5 + $0x18] sm:$0xff]  ;;  %v71_v6 = vld [vmem:[#allocation5 + $0x20] sm:$0xff] }
  0x38   :  { %v563_v5 = vpack.c.bf16 %v70_v4, %v69_v2  ;;  %v72_v7 = vld [vmem:[#allocation5 + $0x28] sm:$0xff]  ;;  %v59_v9 = vld [vmem:[#allocation2] sm:$0xff]  ;;  %v73_v10 = vld [vmem:[#allocation5 + $0x30] sm:$0xff] }
  0x39   :  { %560 = vmatprep.subr.bf16.mxu0 %v559_v3  ;;  %v567_v8 = vpack.c.bf16 %v72_v7, %v71_v6  ;;  %v74_v11 = vld [vmem:[#allocation5 + $0x38] sm:$0xff]  ;;  %503 = vmatprep.mubr.f32.mxu0 %v59_v9  ;;  %v822_v12 = vld [vmem:[#allocation2 + $0x10] sm:$0xff]  ;;  %v188_v13 = vmul.f32 %v59_v9, %v59_v9  ;;  %v60_v14 = vld [vmem:[#allocation2 + $0x8] sm:$0xff] }
  0x3a   :  { %562 = vmatpush3.bf16.msra.mxu0 %v559_v3  ;;  %v62_v15 = vld [vmem:[#allocation2 + $0x18] sm:$0xff]  ;;  %v190_v16 = vmul.f32 %v822_v12, %v822_v12  ;;  %v189_v17 = vmul.f32 %v60_v14, %v60_v14  ;;  %v275_v18 = vld [vmem:[#allocation7] sm:$0xff]  ;;  %v276_v19 = vld [vmem:[#allocation7 + $0x8] sm:$0xff]  ;;  %v571_v21 = vpack.c.bf16 %v74_v11, %v73_v10 }
  0x3b   :  { %564 = vmatprep.subr.bf16.mxu0 %v563_v5  ;;  %196 = vadd.xlane.f32.xlu0 %v188_v13  ;;  %v277_v20 = vld [vmem:[#allocation7 + $0x10] sm:$0xff]  ;;  %v191_v22 = vmul.f32 %v62_v15, %v62_v15  ;;  %v591_v23 = vpack.c.bf16 %v276_v19, %v275_v18  ;;  %v278_v24 = vld [vmem:[#allocation7 + $0x18] sm:$0xff]  ;;  %v75_v25 = vld [vmem:[#allocation5 + $0x40] sm:$0xff] }
  0x3c   :  { %200 = vadd.xlane.f32.xlu1 %v190_v16  ;;  %v76_v26 = vld [vmem:[#allocation5 + $0x48] sm:$0xff]  ;;  %v63_v27 = vld [vmem:[#allocation2 + $0x20] sm:$0xff]  ;;  %v595_v28 = vpack.c.bf16 %v278_v24, %v277_v20  ;;  %v77_v33 = vld [vmem:[#allocation5 + $0x50] sm:$0xff] }
  0x3d   :  { %592 = vmatprep.subr.bf16.mxu1 %v591_v23  ;;  %v64_v29 = vld [vmem:[#allocation2 + $0x28] sm:$0xff]  ;;  %v192_v30 = vmul.f32 %v63_v27, %v63_v27  ;;  %v575_v31 = vpack.c.bf16 %v76_v26, %v75_v25  ;;  %v78_v34 = vld [vmem:[#allocation5 + $0x58] sm:$0xff]  ;;  %v65_v35 = vld [vmem:[#allocation2 + $0x30] sm:$0xff] }
  0x3e   :  { %566 = vmatpush3.bf16.msra.mxu0 %v563_v5  ;;  %v193_v32 = vmul.f32 %v64_v29, %v64_v29  ;;  %594 = vmatpush3.bf16.msra.mxu1 %v591_v23  ;;  %v66_v36 = vld [vmem:[#allocation2 + $0x38] sm:$0xff]  ;;  %v194_v37 = vmul.f32 %v65_v35, %v65_v35  ;;  %v579_v38 = vpack.c.bf16 %v78_v34, %v77_v33  ;;  %v79_v40 = vld [vmem:[#allocation5 + $0x60] sm:$0xff]  ;;  %v80_v41 = vld [vmem:[#allocation5 + $0x68] sm:$0xff] }
  0x3f   :  { %568 = vmatprep.subr.bf16.mxu0 %v567_v8  ;;  %198 = vadd.xlane.f32.xlu0 %v189_v17  ;;  %v195_v39 = vmul.f32 %v66_v36, %v66_v36  ;;  %v583_v42 = vpack.c.bf16 %v80_v41, %v79_v40  ;;  %v81_v43 = vld [vmem:[#allocation5 + $0x70] sm:$0xff]  ;;  %v82_v44 = vld [vmem:[#allocation5 + $0x78] sm:$0xff]  ;;  %v279_v45 = vld [vmem:[#allocation7 + $0x20] sm:$0xff] }
  0x40   :  { %202 = vadd.xlane.f32.xlu1 %v191_v22  ;;  %596 = vmatprep.subr.bf16.mxu1 %v595_v28  ;;  %v280_v46 = vld [vmem:[#allocation7 + $0x28] sm:$0xff]  ;;  %v587_v48 = vpack.c.bf16 %v82_v44, %v81_v43  ;;  %v281_v49 = vld [vmem:[#allocation7 + $0x30] sm:$0xff]  ;;  %v282_v50 = vld [vmem:[#allocation7 + $0x38] sm:$0xff] }
  0x41   :  { %v599_v47 = vpack.c.bf16 %v280_v46, %v279_v45  ;;  %v603_v51 = vpack.c.bf16 %v282_v50, %v281_v49  ;;  %v283_v52 = vld [vmem:[#allocation7 + $0x40] sm:$0xff]  ;;  %v284_v53 = vld [vmem:[#allocation7 + $0x48] sm:$0xff]  ;;  %v285_v55 = vld [vmem:[#allocation7 + $0x50] sm:$0xff] }
  0x42   :  { %570 = vmatpush3.bf16.msra.mxu0 %v567_v8  ;;  %598 = vmatpush3.bf16.msra.mxu1 %v595_v28  ;;  %v607_v54 = vpack.c.bf16 %v284_v53, %v283_v52  ;;  %v286_v56 = vld [vmem:[#allocation7 + $0x58] sm:$0xff]  ;;  %v287_v58 = vld [vmem:[#allocation7 + $0x60] sm:$0xff]  ;;  %v288_v59 = vld [vmem:[#allocation7 + $0x68] sm:$0xff] }
  0x43   :  { %572 = vmatprep.subr.bf16.mxu0 %v571_v21  ;;  %204 = vadd.xlane.f32.xlu0 %v192_v30  ;;  %v611_v57 = vpack.c.bf16 %v286_v56, %v285_v55  ;;  %v615_v60 = vpack.c.bf16 %v288_v59, %v287_v58  ;;  %v289_v61 = vld [vmem:[#allocation7 + $0x70] sm:$0xff]  ;;  %v290_v62 = vld [vmem:[#allocation7 + $0x78] sm:$0xff]  ;;  %v422_v4 = vld [vmem:[%s847_s2] ss:$0 sm:$0xff]  ;;  %s744_s2 = smov [#allocation8]  }
  0x44   :  { %206 = vadd.xlane.f32.xlu1 %v193_v32  ;;  %600 = vmatprep.subr.bf16.mxu1 %v599_v47  ;;  %v619_v63 = vpack.c.bf16 %v290_v62, %v289_v61  ;;  %s409_s26 = sshll.u32 %s744_s2, 4  ;;  %s410_s26 = int_to_ptr.vmem [resolvable:$true] %s409_s26 }
  0x45   :  { %s711_s29 = scalar_lea.vmem %s410_s26, 1024  ;;  %p716_p11 = scmp.lt.s32.totalorder %s410_s26, %s410_s26 }
  0x46   :  { %574 = vmatpush3.bf16.msra.mxu0 %v571_v21  ;;  %602 = vmatpush3.bf16.msra.mxu1 %v599_v47  ;;  %p712_p10 = scmp.ne.s32.totalorder %s410_s26, %s711_s29  ;;  %p717_p12 = scmp.lt.s32.totalorder %s711_s29, %s711_s29 }
  0x47   :  { %576 = vmatprep.subr.bf16.mxu0 %v575_v31  ;;  %208 = vadd.xlane.f32.xlu0 %v194_v37 }
  0x48   :  { %210 = vadd.xlane.f32.xlu1 %v195_v39  ;;  %604 = vmatprep.subr.bf16.mxu1 %v603_v51  ;;  %p718_p13 = por %p717_p12, %p716_p11 }
  0x4a   :  { %578 = vmatpush3.bf16.msra.mxu0 %v575_v31  ;;  %606 = vmatpush3.bf16.msra.mxu1 %v603_v51  ;;  %p719_p0 = pnand %p718_p13, %p712_p10 }
  0x4b   :  { %580 = vmatprep.subr.bf16.mxu0 %v579_v38  ;;  %608 = vmatprep.subr.bf16.mxu1 %v607_v54 }
  0x4e   :  { %582 = vmatpush3.bf16.msra.mxu0 %v579_v38  ;;  %610 = vmatpush3.bf16.msra.mxu1 %v607_v54 }
  0x4f   :  { %584 = vmatprep.subr.bf16.mxu0 %v583_v42  ;;  %612 = vmatprep.subr.bf16.mxu1 %v611_v57 }
  0x52   :  { %586 = vmatpush3.bf16.msra.mxu0 %v583_v42  ;;  %614 = vmatpush3.bf16.msra.mxu1 %v611_v57 }
  0x53   :  { %588 = vmatprep.subr.bf16.mxu0 %v587_v48  ;;  %616 = vmatprep.subr.bf16.mxu1 %v615_v60 }
  0x56   :  { %590 = vmatpush3.bf16.msra.mxu0 %v587_v48  ;;  %618 = vmatpush3.bf16.msra.mxu1 %v615_v60 }
  0x57   :  { %620 = vmatprep.subr.bf16.mxu1 %v619_v63 }
  0x59   :  { %504 = vmatmul.mubr.f32.vlgmr.msra.gmra.mrb[0].mxu0 %v60_v14 }
  0x5a   :  { %506 = vmatprep.mubr.f32.mxu0 %v822_v12  ;;  %622 = vmatpush3.bf16.msra.mxu1 %v619_v63 }
  0x5d   :  { %507 = vmatmul.mubr.f32.gmra.mrb[2].mxu0 %v62_v15 }
  0x5e   :  { %509 = vmatprep.mubr.f32.mxu0 %v63_v27 }
  0x61   :  { %510 = vmatmul.mubr.f32.gmra.mrb[4].mxu0 %v64_v29 }
  0x62   :  { %512 = vmatprep.mubr.f32.mxu0 %v65_v35 }
  0x65   :  { %513 = vmatmul.mubr.f32.gmra.mrb[6].mxu0 %v66_v36 }
  0xc8   :  { %v197_v0 = vpop.xlane.xlu0 %196 }
  0xc9   :  { %v201_v1 = vpop.xlane.xlu1 %200  ;;  %v219_v9 = vadd.f32 %v422_v4, %v197_v0 }
  0xca   :  { %v221_v20 = vadd.f32 %v422_v4, %v201_v1 }
  0xcc   :  { %v199_v2 = vpop.xlane.xlu0 %198 }
  0xcd   :  { %v203_v3 = vpop.xlane.xlu1 %202  ;;  %v220_v5 = vadd.f32 %v422_v4, %v199_v2 }
  0xce   :  { %v222_v13 = vadd.f32 %v422_v4, %v203_v3 }
  0xd0   :  { %v205_v14 = vpop.xlane.xlu0 %204 }
  0xd1   :  { %v207_v11 = vpop.xlane.xlu1 %206  ;;  %v223_v28 = vadd.f32 %v422_v4, %v205_v14 }
  0xd2   :  { %v224_v25 = vadd.f32 %v422_v4, %v207_v11 }
  0xd4   :  { %v209_v35 = vpop.xlane.xlu0 %208 }
  0xd5   :  { %v211_v29 = vpop.xlane.xlu1 %210  ;;  %v225_v45 = vadd.f32 %v422_v4, %v209_v35 }
  0xd6   :  { %v226_v41 = vadd.f32 %v422_v4, %v211_v29 }
 0x12c   :  { %v505_v6 = vpop.f32.mrb[0].mxu0 }
 0x12d   :  { %v228_v7 = vmul.f32 2.0, %v505_v6  ;;  %v149_v8 = vpop.f32.mrb[1].mxu0 }
 0x12e   :  { %v227_v10 = vmul.f32 2.0, %v149_v8 }
 0x12f   :  { %v236_v12 = vsub.f32 %v220_v5, %v228_v7 }
 0x130   :  { %v235_v15 = vsub.f32 %v219_v9, %v227_v10  ;;  %v508_v16 = vpop.f32.mrb[2].mxu0 }
 0x131   :  { %v244_v17 = vmax.f32 %v236_v12, 0.0  ;;  %v230_v18 = vmul.f32 2.0, %v508_v16  ;;  %v159_v19 = vpop.f32.mrb[3].mxu0 }
 0x132   :  { %v243_v21 = vmax.f32 %v235_v15, 0.0  ;;  %v229_v22 = vmul.f32 2.0, %v159_v19 }
 0x133   :  { %v252_v23 = vmul.f32 -0.03125, %v244_v17  ;;  %v238_v24 = vsub.f32 %v222_v13, %v230_v18 }
 0x134   :  { %v237_v26 = vsub.f32 %v221_v20, %v229_v22  ;;  %v511_v27 = vpop.f32.mrb[4].mxu0  ;;  %v251_v30 = vmul.f32 -0.03125, %v243_v21 }
 0x135   :  { %v261_v31 = vmul.f32 1.442695, %v252_v23  ;;  %v246_v32 = vmax.f32 %v238_v24, 0.0  ;;  %v232_v33 = vmul.f32 2.0, %v511_v27  ;;  %v169_v34 = vpop.f32.mrb[5].mxu0 }
 0x136   :  { %v245_v36 = vmax.f32 %v237_v26, 0.0  ;;  %v231_v37 = vmul.f32 2.0, %v169_v34  ;;  %v259_v38 = vmul.f32 1.442695, %v251_v30 }
 0x137   :  { %v254_v39 = vmul.f32 -0.03125, %v246_v32  ;;  %v240_v40 = vsub.f32 %v224_v25, %v232_v33 }
 0x138   :  { %v253_v42 = vmul.f32 -0.03125, %v245_v36  ;;  %v239_v43 = vsub.f32 %v223_v28, %v231_v37  ;;  %v514_v44 = vpop.f32.mrb[6].mxu0  ;;  %629 = vpow2.f32 %v259_v38 }
 0x139   :  { %631 = vpow2.f32 %v261_v31  ;;  %v265_v46 = vmul.f32 1.442695, %v254_v39  ;;  %v248_v47 = vmax.f32 %v240_v40, 0.0  ;;  %v234_v48 = vmul.f32 2.0, %v514_v44  ;;  %v179_v49 = vpop.f32.mrb[7].mxu0 }
 0x13a   :  { %v263_v50 = vmul.f32 1.442695, %v253_v42  ;;  %v247_v51 = vmax.f32 %v239_v43, 0.0  ;;  %v233_v52 = vmul.f32 2.0, %v179_v49 }
 0x13b   :  { %v256_v53 = vmul.f32 -0.03125, %v248_v47  ;;  %v242_v54 = vsub.f32 %v226_v41, %v234_v48 }
 0x13c   :  { %633 = vpow2.f32 %v263_v50  ;;  %v255_v55 = vmul.f32 -0.03125, %v247_v51  ;;  %v241_v56 = vsub.f32 %v225_v45, %v233_v52 }
 0x13d   :  { %635 = vpow2.f32 %v265_v46  ;;  %v269_v57 = vmul.f32 1.442695, %v256_v53  ;;  %v250_v58 = vmax.f32 %v242_v54, 0.0 }
 0x13e   :  { %v267_v59 = vmul.f32 1.442695, %v255_v55  ;;  %v249_v60 = vmax.f32 %v241_v56, 0.0 }
 0x13f   :  { %v258_v61 = vmul.f32 -0.03125, %v250_v58 }
 0x140   :  { %637 = vpow2.f32 %v267_v59  ;;  %v257_v62 = vmul.f32 -0.03125, %v249_v60 }
 0x141   :  { %639 = vpow2.f32 %v269_v57  ;;  %v273_v63 = vmul.f32 1.442695, %v258_v61 }
 0x142   :  { %v630_v0 = vpop.eup %629  ;;  %v271_v1 = vmul.f32 1.442695, %v257_v62 }
 0x143   :  { %v632_v2 = vpop.eup %631  ;;  %547 = vmatprep.mubr.f32.mxu1 %v630_v0 }
 0x144   :  { %641 = vpow2.f32 %v271_v1  ;;  %548 = vmatmul.mubr.f32.vlgmr.msra.gmra.mrb[0].mxu1 %v632_v2 }
 0x145   :  { %643 = vpow2.f32 %v273_v63 }
 0x146   :  { %v634_v3 = vpop.eup %633 }
 0x147   :  { %v636_v4 = vpop.eup %635  ;;  %550 = vmatprep.mubr.f32.mxu1 %v634_v3 }
 0x148   :  { %551 = vmatmul.mubr.f32.gmra.mrb[2].mxu1 %v636_v4 }
 0x14a   :  { %v638_v5 = vpop.eup %637 }
 0x14b   :  { %v640_v6 = vpop.eup %639  ;;  %553 = vmatprep.mubr.f32.mxu1 %v638_v5 }
 0x14c   :  { %554 = vmatmul.mubr.f32.gmra.mrb[4].mxu1 %v640_v6 }
 0x14e   :  { %v642_v7 = vpop.eup %641 }
 0x14f   :  { %v644_v8 = vpop.eup %643  ;;  %556 = vmatprep.mubr.f32.mxu1 %v642_v7 }
 0x150   :  { %557 = vmatmul.mubr.f32.gmra.mrb[6].mxu1 %v644_v8 }
 0x217   :  { %v549_v9 = vpop.f32.mrb[0].mxu1 }
 0x218   :  { %397 = vst [vmem:[#allocation8 + $0x8] sm:$0xff] %v549_v9  ;;  %v357_v10 = vpop.f32.mrb[1].mxu1 }
 0x219   :  { %396 = vst [vmem:[#allocation8] sm:$0xff] %v357_v10 }
 0x21b   :  { %v552_v11 = vpop.f32.mrb[2].mxu1 }
 0x21c   :  { %399 = vst [vmem:[#allocation8 + $0x18] sm:$0xff] %v552_v11  ;;  %v367_v12 = vpop.f32.mrb[3].mxu1 }
 0x21d   :  { %398 = vst [vmem:[#allocation8 + $0x10] sm:$0xff] %v367_v12 }
 0x21f   :  { %v555_v13 = vpop.f32.mrb[4].mxu1 }
 0x220   :  { %401 = vst [vmem:[#allocation8 + $0x28] sm:$0xff] %v555_v13  ;;  %v377_v14 = vpop.f32.mrb[5].mxu1 }
 0x221   :  { %400 = vst [vmem:[#allocation8 + $0x20] sm:$0xff] %v377_v14 }
 0x223   :  { %v558_v15 = vpop.f32.mrb[6].mxu1 }
 0x224   :  { %403 = vst [vmem:[#allocation8 + $0x38] sm:$0xff] %v558_v15  ;;  %v387_v16 = vpop.f32.mrb[7].mxu1 }
 0x225   :  { %402 = vst [vmem:[#allocation8 + $0x30] sm:$0xff] %v387_v16 }
 0x226   :  { %722 = shalt.err (!%p719_p0)
}
 0x227   :  { %s723_s6 = scalar_lea.hbm %s849_s4, 1024 }
 0x228   :  { %p724_p1 = scmp.ne.s32.totalorder %s849_s4, %s723_s6  ;;  %p727_p2 = scmp.lt.u32.totalorder %s723_s6, %s849_s4 }
 0x22a   :  { %p729_p3 = pnand %p727_p2, %p724_p1 }
 0x22c   :  { %732 = shalt.err (!%p729_p3)
}
 0x22d   :  { %415 = dma.vmem_to_hbm [thread:$0]  %s410_s26, 1024, %s849_s4, [#allocation4], %s741_s27, %s741_s27, %s742_s28  }
 0x22e   :  { %737 = dma.done.wait [#allocation4], 1024  }
 0x22f   :  { %738 = vsyncadd [#allocation4], 4294966272 }
 0x230   :  { %419 = vsyncpa [#allocation3], 1 }
 0x231   :  { %420 = vsyncpa [#allocation6], 1 }
 0x232   :  { %421 = vsyncpa [#allocation4], 1 }

</bundles_post_ra>
